<compile_context>
chip_gen: v7x
topology: tpu7x:2x2x1
jax: 0.10.0
libtpu: 0.0.40
codegen_flags: <defaults>
</compile_context>

<pallas_src>
import jax
import jax.numpy as jnp
from jax.experimental import pallas as pl
from jax.experimental.pallas import tpu as pltpu


def _round_up(n, m):
    return ((n + m - 1) // m) * m


def _sublane_tile(dtype):
    # Native sublane tile: 8 rows for 4-byte dtypes, 16 for 2-byte, 32 for 1-byte.
    return 8 * (4 // jnp.dtype(dtype).itemsize)


def _vmem_budgets():
    """Return (double-buffered working-set budget, vmem_limit_bytes) per chip gen."""
    try:
        kind = jax.devices()[0].device_kind.lower()
    except Exception:
        kind = ""
    if "v7" in kind:
        # v7x: only 64 MiB VMEM per TensorCore — leave headroom for Mosaic scratch.
        return 24 * 1024 * 1024, 32 * 1024 * 1024
    if "v5" in kind or "v6" in kind:
        # v5e / v6e: 128 MiB physical VMEM — use far more than the scoped default.
        return 64 * 1024 * 1024, 96 * 1024 * 1024
    return 16 * 1024 * 1024, 32 * 1024 * 1024


def _choose_tm(n_modes, per_mode_bytes, budget_bytes):
    """Largest power-of-two TM in [8, 256] whose double-buffered working set fits
    the budget and whose padded mode grid has >= 4 steps (>= 2 per TC on v7x).
    Falls back to 8 (most steps, least Mp padding) for tiny mode counts."""
    for tm in (256, 128, 64, 32, 16, 8):
        mp = _round_up(n_modes, tm)
        if 2 * tm * per_mode_bytes <= budget_bytes and mp // tm >= 4:
            return tm
    return 8


def _spectral_mul_kernel(x_ref, w_ref, o_ref):
    """One grid step = TM Fourier modes.

    x_ref: (TM, Bp, Kp)  [real | imag]-stacked spectral activations (bf16)
    w_ref: (TM, Kp, Np)  per-mode weight blocks [[wr, wi], [-wi, wr]] (bf16)
    o_ref: (TM, Bp, Np)  bf16 output, [real | imag] stacked along lanes
    """
    o_ref[...] = jnp.einsum(
        'mbk,mkn->mbn', x_ref[...], w_ref[...],
        preferred_element_type=jnp.float32).astype(o_ref.dtype)


def _spectral_mul_pallas(x, w, tm, out_dtype, vmem_limit_bytes):
    """x: (Mp, Bp, Kp), w: (Mp, Kp, Np), Mp % tm == 0. Returns (Mp, Bp, Np)."""
    mp, bp, kp = x.shape
    np_ = w.shape[-1]

    # Last two dims of every block span the full array dims, so the (8,128)
    # divisibility rule is waived — no lane padding of K/N needed.
    x_spec = pl.BlockSpec((tm, bp, kp), lambda m: (m, 0, 0))
    w_spec = pl.BlockSpec((tm, kp, np_), lambda m: (m, 0, 0))
    o_spec = pl.BlockSpec((tm, bp, np_), lambda m: (m, 0, 0))

    cost = pl.CostEstimate(
        flops=2 * mp * bp * kp * np_,
        transcendentals=0,
        bytes_accessed=(x.size * x.dtype.itemsize
                        + w.size * w.dtype.itemsize
                        + mp * bp * np_ * jnp.dtype(out_dtype).itemsize))

    return pl.pallas_call(
        _spectral_mul_kernel,
        out_shape=jax.ShapeDtypeStruct((mp, bp, np_), out_dtype),
        grid_spec=pltpu.PrefetchScalarGridSpec(
            num_scalar_prefetch=0,
            grid=(mp // tm,),
            in_specs=[x_spec, w_spec],
            out_specs=o_spec,
        ),
        compiler_params=pltpu.CompilerParams(
            dimension_semantics=("parallel",),
            vmem_limit_bytes=vmem_limit_bytes,
        ),
        cost_estimate=cost,
    )(x, w)


class SpectralConv2d:
    """JAX port of the PyTorch SpectralConv2d module."""

    def __init__(self, in_channels, out_channels, modes1, modes2, key,
                 compute_dtype=jnp.bfloat16):
        self.in_channels = in_channels
        self.out_channels = out_channels
        self.modes1 = modes1
        self.modes2 = modes2
        self.compute_dtype = compute_dtype
        scale = 1.0 / (in_channels * out_channels)

        k1, k2, k3, k4 = jax.random.split(key, 4)
        shape = (in_channels, out_channels, modes1, modes2)
        # torch.rand(..., dtype=cfloat): real & imag each ~ U[0,1)
        self.w1_r = scale * jax.random.uniform(k1, shape, jnp.float32)
        self.w1_i = scale * jax.random.uniform(k2, shape, jnp.float32)
        self.w2_r = scale * jax.random.uniform(k3, shape, jnp.float32)
        self.w2_i = scale * jax.random.uniform(k4, shape, jnp.float32)

        # Static per-module kernel geometry.
        itemsize = jnp.dtype(compute_dtype).itemsize
        self._sub = _sublane_tile(compute_dtype)             # 16 for bf16
        M = 2 * modes1 * modes2
        self._M = M
        self._Kp = _round_up(2 * in_channels, self._sub)     # contraction dim (weight sublanes)
        self._Np = 2 * out_channels                          # output lanes — NOT padded to 128

        # Choose TM once using the smallest legal batch tile; the padded mode
        # count Mp is a multiple of this TM (and of every smaller power of two,
        # so TM can only shrink at call time without repadding the weights).
        self._budget_bytes, self._vmem_limit_bytes = _vmem_budgets()
        per_mode_nominal = (self._sub * self._Kp * itemsize
                            + self._Kp * self._Np * itemsize
                            + self._sub * self._Np * itemsize)
        self._tm0 = _choose_tm(M, per_mode_nominal, self._budget_bytes)
        self._Mp = _round_up(M, self._tm0)

        # Mode-major, real/imag-stacked, padded weight tensor, built ONCE.
        self._w_packed = self._pack_weights()                # (Mp, Kp, Np) bf16

    def _pack_weights(self):
        m1, m2 = self.modes1, self.modes2
        cin, cout = self.in_channels, self.out_channels

        def mode_major(w):                                   # (Cin,Cout,m1,m2)->(m1*m2,Cin,Cout)
            return jnp.transpose(w, (2, 3, 0, 1)).reshape(m1 * m2, cin, cout)

        wr = jnp.concatenate([mode_major(self.w1_r), mode_major(self.w2_r)], axis=0)
        wi = jnp.concatenate([mode_major(self.w1_i), mode_major(self.w2_i)], axis=0)
        top = jnp.concatenate([wr, wi], axis=-1)             # (M, Cin, 2Cout)
        bot = jnp.concatenate([-wi, wr], axis=-1)            # (M, Cin, 2Cout)
        w = jnp.concatenate([top, bot], axis=-2)             # (M, 2Cin, 2Cout)
        w = jnp.pad(w, ((0, self._Mp - self._M),
                        (0, self._Kp - 2 * cin),
                        (0, 0)))
        return w.astype(self.compute_dtype)

    def __call__(self, x):
        # x: (B, Cin, H, W) float32 (NCHW, same as PyTorch)
        B, Cin, H, W = x.shape
        m1, m2 = self.modes1, self.modes2
        Cout = self.out_channels
        Wf = W // 2 + 1
        M = self._M

        # Truncated forward FFT: rfft along W, keep only the m2 needed columns,
        # then FFT along H on just those columns (Wf/m2 less H-axis work).
        xw = jnp.fft.rfft(x, axis=-1)[..., :m2]              # (B, Cin, H, m2)
        x_ft = jnp.fft.fft(xw, axis=-2)                      # (B, Cin, H, m2)
        x_low = x_ft[:, :, :m1, :]                           # (B, Cin, m1, m2)
        x_high = x_ft[:, :, H - m1:, :]                      # (B, Cin, m1, m2)

        def to_mode_major(blk):                              # -> (m1*m2, B, Cin)
            return jnp.transpose(blk, (2, 3, 0, 1)).reshape(m1 * m2, B, Cin)

        xm = jnp.concatenate([to_mode_major(x_low), to_mode_major(x_high)], axis=0)
        # Real/imag stacked along the channel (lane) axis: (M, B, 2*Cin)
        xs = jnp.concatenate([jnp.real(xm), jnp.imag(xm)], axis=-1)

        # Pad batch to the bf16 sublane tile and K to the packed weight's K.
        itemsize = jnp.dtype(self.compute_dtype).itemsize
        Bp = _round_up(B, self._sub)
        xs = jnp.pad(xs, ((0, self._Mp - M), (0, Bp - B), (0, self._Kp - 2 * Cin)))
        xs = xs.astype(self.compute_dtype)

        # Shrink TM only if this batch pushes the double-buffered working set
        # over the per-generation budget (TM always divides the fixed Mp).
        per_mode = (Bp * self._Kp * itemsize
                    + self._Kp * self._Np * itemsize
                    + Bp * self._Np * itemsize)
        tm = self._tm0
        while tm > 8 and 2 * tm * per_mode > self._budget_bytes:
            tm //= 2

        # Hot path: fused, blocked complex channel mixing in Pallas.
        out = _spectral_mul_pallas(xs, self._w_packed, tm,
                                   self.compute_dtype, self._vmem_limit_bytes)

        out = out[:M, :B, :].astype(jnp.float32)             # (M, B, 2Cout)
        out_c = (out[..., :Cout] + 1j * out[..., Cout:]).astype(jnp.complex64)
        out_c = out_c.reshape(2, m1, m2, B, Cout)
        out_c = jnp.transpose(out_c, (0, 3, 4, 1, 2))        # (2, B, Cout, m1, m2)

        # Assemble the sparse spectrum by concatenation (no zeros + scatter),
        # then the truncated inverse: ifft along H on m2 columns, zero-pad to
        # Wf, irfft along W.
        if H >= 2 * m1:
            mid = jnp.zeros((B, Cout, H - 2 * m1, m2), jnp.complex64)
            out_cols = jnp.concatenate([out_c[0], mid, out_c[1]], axis=-2)
        else:
            # Degenerate overlap: match PyTorch's overwrite semantics.
            out_cols = jnp.zeros((B, Cout, H, m2), jnp.complex64)
            out_cols = out_cols.at[:, :, :m1, :].set(out_c[0])
            out_cols = out_cols.at[:, :, H - m1:, :].set(out_c[1])

        tmp = jnp.fft.ifft(out_cols, axis=-2)                # (B, Cout, H, m2)
        tmp = jnp.pad(tmp, ((0, 0), (0, 0), (0, 0), (0, Wf - m2)))
        y = jnp.fft.irfft(tmp, n=W, axis=-1)
        return y.astype(jnp.float32)                         # (B, Cout, H, W)


def _reference(module, x):
    """Pure-JAX (f32, untruncated rfft2/irfft2) reference of the PyTorch forward."""
    B, Cin, H, W = x.shape
    m1, m2 = module.modes1, module.modes2
    Cout = module.out_channels
    Wf = W // 2 + 1
    x_ft = jnp.fft.rfft2(x, axes=(-2, -1))
    w1 = module.w1_r + 1j * module.w1_i
    w2 = module.w2_r + 1j * module.w2_i
    out_ft = jnp.zeros((B, Cout, H, Wf), dtype=jnp.complex64)
    out_ft = out_ft.at[:, :, :m1, :m2].set(
        jnp.einsum('bixy,ioxy->boxy', x_ft[:, :, :m1, :m2], w1))
    out_ft = out_ft.at[:, :, H - m1:, :m2].set(
        jnp.einsum('bixy,ioxy->boxy', x_ft[:, :, H - m1:, :m2], w2))
    return jnp.fft.irfft2(out_ft, s=(H, W), axes=(-2, -1)).astype(jnp.float32)


if __name__ == "__main__":
    key = jax.random.PRNGKey(0)
    k_param, k_x = jax.random.split(key)

    B, Cin, Cout, H, W = 2, 4, 4, 16, 16
    modes1, modes2 = 4, 4

    module = SpectralConv2d(Cin, Cout, modes1, modes2, k_param)
    x = jax.random.normal(k_x, (B, Cin, H, W), dtype=jnp.float32)

    y = jax.block_until_ready(module(x))
    y_ref = jax.block_until_ready(_reference(module, x))

    assert y.shape == (B, Cout, H, W)
    # bf16 kernel operands/output (f32 accumulation) => scale-relative check.
    err = float(jnp.max(jnp.abs(y - y_ref)))
    scale = float(jnp.max(jnp.abs(y_ref))) + 1e-6
    assert err / scale < 3e-2, f"mismatch vs reference: rel err {err / scale:.3e}"

    print("KERNEL_OK")
</pallas_src>

<mosaic_0001>
module attributes {stable_mosaic.version = 11 : i64} {
  func.func @_spectral_mul_kernel(%arg0: i32, %arg1: memref<8x16x16xbf16, #tpu.memory_space<vmem>>, %arg2: memref<8x16x8xbf16, #tpu.memory_space<vmem>>, %arg3: memref<8x16x8xbf16, #tpu.memory_space<vmem>>) attributes {dimension_semantics = [#tpu.dimension_semantics<parallel>], iteration_bounds = array<i64: 4>, scalar_prefetch = 0 : i64, scratch_operands = 0 : i64, tpu.core_type = #tpu.core_type<tc>, window_params = [{transform_indices = @transform_0, window_bounds = array<i64: 8, 16, 16>}, {transform_indices = @transform_1, window_bounds = array<i64: 8, 16, 8>}, {transform_indices = @transform_2, window_bounds = array<i64: 8, 16, 8>}]} {
    %c0 = arith.constant 0 : index
    %c0_0 = arith.constant 0 : index
    %c0_1 = arith.constant 0 : index
    %0 = vector.load %arg1[%c0, %c0_0, %c0_1] : memref<8x16x16xbf16, #tpu.memory_space<vmem>>, vector<8x16x16xbf16>
    %c0_2 = arith.constant 0 : index
    %c0_3 = arith.constant 0 : index
    %c0_4 = arith.constant 0 : index
    %1 = vector.load %arg2[%c0_2, %c0_3, %c0_4] : memref<8x16x8xbf16, #tpu.memory_space<vmem>>, vector<8x16x8xbf16>
    "tpu.trace_start"() <{level = 10 : i32, message = "mbk,mkn->mbn"}> : () -> ()
    %cst = arith.constant dense<0.000000e+00> : vector<8x16x8xf32>
    %2 = tpu.matmul %0, %1, %cst {dimension_numbers = #tpu.dot_dimension_numbers<[2], [1], [1], [2], [0, 0, 0, 1, 1, 2], [0], [0]>} : vector<8x16x16xbf16>, vector<8x16x8xbf16>, vector<8x16x8xf32> -> vector<8x16x8xf32>
    "tpu.trace_stop"() : () -> ()
    %3 = arith.truncf %2 : vector<8x16x8xf32> to vector<8x16x8xbf16>
    %c0_5 = arith.constant 0 : index
    %c0_6 = arith.constant 0 : index
    %c0_7 = arith.constant 0 : index
    %4 = vector.load %arg3[%c0_5, %c0_6, %c0_7] : memref<8x16x8xbf16, #tpu.memory_space<vmem>>, vector<8x16x8xbf16>
    tpu.vector_store %arg3[%c0_5, %c0_6, %c0_7], %3 {strides = array<i32>} : memref<8x16x8xbf16, #tpu.memory_space<vmem>>, vector<8x16x8xbf16>,
    return
  }
  func.func @transform_0(%arg0: i32) -> (i32, i32, i32) {
    %c0_i32 = arith.constant 0 : i32
    %c0_i32_0 = arith.constant 0 : i32
    %c0_i32_1 = arith.constant 0 : i32
    return %arg0, %c0_i32, %c0_i32_0 : i32, i32, i32
  }
  func.func @transform_1(%arg0: i32) -> (i32, i32, i32) {
    %c0_i32 = arith.constant 0 : i32
    %c0_i32_0 = arith.constant 0 : i32
    %c0_i32_1 = arith.constant 0 : i32
    return %arg0, %c0_i32, %c0_i32_0 : i32, i32, i32
  }
  func.func @transform_2(%arg0: i32) -> (i32, i32, i32) {
    %c0_i32 = arith.constant 0 : i32
    %c0_i32_0 = arith.constant 0 : i32
    %c0_i32_1 = arith.constant 0 : i32
    return %arg0, %c0_i32, %c0_i32_0 : i32, i32, i32
  }
}

</mosaic_0001>

<bundles_post_ra>
// kernel: tpu_custom_call.1
= control target key start
LH: loop header
LB: loop body
LE: loop exit
PB: predicated region body
PF: predicated region fallthrough
CT: control target
= control target key end

     0   :  { %s992_s9 = smov 0   ;;  %s1087_s0 = inlined_call_operand.vmem [shape: bf16[32,16,16], index: 0, kind: input, shape index: {}]   ;;  %s1088_s1 = inlined_call_operand.vmem [shape: bf16[32,16,8], index: 1, kind: input, shape index: {}]   ;;  %s1089_s2 = inlined_call_operand.vmem [shape: bf16[32,16,8], index: 2, kind: output, shape index: {}]  }
   0x1 LB: > { %s802_s10 = sadd.s32 4294967295, %s973_s9   ;;  %p806_p0 = scmp.ge.s32.totalorder %s973_s9, 1  ;;  %s973_s9 = sphi %s992_s9, %s12_s9  }
   0x2   : > { %p126_p1 = scmp.lt.s32.totalorder %s973_s9, 5 }
   0x4   : > { %p127_p2 = pnand %p806_p0, %p126_p1 }
   0x5   : > { %s807_s11 = sshll.u32 (!%p127_p2), %s802_s10, 3  ;;  %v975_v0 = vmov (!%p127_p2), 0.0   ;;  %vm976_vm0 = vmmov (!%p127_p2), 0   ;;  %vm221_vm1 = vcmask (!%p127_p2), 130048   ;;  %vm715_vm2 = vcmask (!%p127_p2), 60416  }
   0x6   : > { %130 = sbr.rel (%p127_p2) target bundleno = 261 (0x105), region = 28  ;;  %893 = vmatprep.subr.bf16.mxu0 (!%p127_p2), %v975_v0  ;;  %899 = vmatprep.subr.bf16.mxu1 (!%p127_p2), %v975_v0  ;;  %p157_p3 = scmp.lt.s32.totalorder (!%p127_p2), %s807_s11, 31 }
   0x7   : > { %895 = vmatprep.mubr.msk.bf16.mxu0 (!%p127_p2), %vm976_vm0, %v975_v0  ;;  %901 = vmatprep.mubr.msk.bf16.mxu1 (!%p127_p2), %vm976_vm0, %v975_v0 }
   0xd   : > { %s1091_s11 = smov (!%p157_p3, %s807_s11), 31 }
   0xe   : > { %s1002_s12 = sshll.u32 %s1091_s11, 3 }
   0xf   : > { %s1008_s15 = scalar_lea.vmem %s1087_s0, %s1002_s12  ;;  %s1014_s18 = scalar_lea.vmem %s1088_s1, %s1002_s12 }
  0x10   : > { %v951_v1 = vld [vmem:[%s1014_s18] sm:$0xff]   ;;  %v952_v2 = vld [vmem:[%s1014_s18 + $0x8] sm:$0xff]   ;;  %v955_v5 = vld [vmem:[%s1014_s18 + $0x10] sm:$0xff]   ;;  %s1050_s21 = scalar_lea.vmem %s1089_s2, %s1002_s12 }
  0x11   : > { %894 = vmatpush3.bf16.msra.mxu0 %v951_v1  ;;  %v953_v3 = vld [vmem:[%s1008_s15] sm:$0xff]   ;;  %900 = vmatpush3.bf16.msra.mxu1 %v952_v2  ;;  %v954_v4 = vld [vmem:[%s1008_s15 + $0x8] sm:$0xff]   ;;  %v956_v6 = vld [vmem:[%s1014_s18 + $0x18] sm:$0xff]  }
  0x12   : > { %905 = vmatprep.subr.bf16.mxu0 %v975_v0  ;;  %911 = vmatprep.subr.bf16.mxu1 %v975_v0  ;;  %v957_v7 = vld [vmem:[%s1008_s15 + $0x10] sm:$0xff]   ;;  %v958_v8 = vld [vmem:[%s1008_s15 + $0x18] sm:$0xff]   ;;  %v959_v9 = vld [vmem:[%s1014_s18 + $0x20] sm:$0xff]  }
  0x13   : > { %v960_v10 = vld [vmem:[%s1014_s18 + $0x28] sm:$0xff]   ;;  %v961_v11 = vld [vmem:[%s1008_s15 + $0x20] sm:$0xff]   ;;  %v963_v13 = vld [vmem:[%s1014_s18 + $0x30] sm:$0xff]  }
  0x14   : > { %896 = vmatmul.mubr.msk.bf16.vlgmr.msra.gmra.mrb[0].mxu0 %vm221_vm1, %v953_v3  ;;  %902 = vmatmul.mubr.msk.bf16.vlgmr.msra.gmra.mrb[0].mxu1 %vm221_vm1, %v954_v4  ;;  %v962_v12 = vld [vmem:[%s1008_s15 + $0x28] sm:$0xff]   ;;  %v964_v14 = vld [vmem:[%s1014_s18 + $0x38] sm:$0xff]   ;;  %v965_v15 = vld [vmem:[%s1008_s15 + $0x30] sm:$0xff]  }
  0x15   : > { %906 = vmatpush3.bf16.msra.mxu0 %v955_v5  ;;  %912 = vmatpush3.bf16.msra.mxu1 %v956_v6  ;;  %v966_v16 = vld [vmem:[%s1008_s15 + $0x38] sm:$0xff]  }
  0x16   : > { %907 = vmatprep.mubr.msk.bf16.mxu0 %vm976_vm0, %v975_v0  ;;  %913 = vmatprep.mubr.msk.bf16.mxu1 %vm976_vm0, %v975_v0 }
  0x17   : > { %917 = vmatprep.subr.bf16.mxu0 %v975_v0  ;;  %923 = vmatprep.subr.bf16.mxu1 %v975_v0 }
  0x1c   : > { %908 = vmatmul.mubr.msk.bf16.vlgmr.msra.gmra.mrb[4].mxu0 %vm221_vm1, %v957_v7  ;;  %914 = vmatmul.mubr.msk.bf16.vlgmr.msra.gmra.mrb[4].mxu1 %vm221_vm1, %v958_v8 }
  0x1d   : > { %918 = vmatpush3.bf16.msra.mxu0 %v959_v9  ;;  %924 = vmatpush3.bf16.msra.mxu1 %v960_v10 }
  0x1e   : > { %919 = vmatprep.mubr.msk.bf16.mxu0 %vm976_vm0, %v975_v0  ;;  %925 = vmatprep.mubr.msk.bf16.mxu1 %vm976_vm0, %v975_v0 }
  0x1f   : > { %929 = vmatprep.subr.bf16.mxu0 %v975_v0  ;;  %935 = vmatprep.subr.bf16.mxu1 %v975_v0 }
  0x24   : > { %920 = vmatmul.mubr.msk.bf16.vlgmr.msra.gmra.mrb[8].mxu0 %vm221_vm1, %v961_v11  ;;  %926 = vmatmul.mubr.msk.bf16.vlgmr.msra.gmra.mrb[8].mxu1 %vm221_vm1, %v962_v12 }
  0x25   : > { %930 = vmatpush3.bf16.msra.mxu0 %v963_v13  ;;  %936 = vmatpush3.bf16.msra.mxu1 %v964_v14 }
  0x26   : > { %931 = vmatprep.mubr.msk.bf16.mxu0 %vm976_vm0, %v975_v0  ;;  %937 = vmatprep.mubr.msk.bf16.mxu1 %vm976_vm0, %v975_v0 }
  0x2c   : > { %932 = vmatmul.mubr.msk.bf16.vlgmr.msra.gmra.mrb[12].mxu0 %vm221_vm1, %v965_v15  ;;  %938 = vmatmul.mubr.msk.bf16.vlgmr.msra.gmra.mrb[12].mxu1 %vm221_vm1, %v966_v16 }
  0xe7   : > { %v259_v17 = vpop.f32.mrb[0].mxu0  ;;  %v314_v19 = vpop.f32.mrb[0].mxu1 }
  0xe8   : > { %v861_v18 = vpack.c.bf16 %v259_v17, %v259_v17  ;;  %v897_v20 = vpop.f32.mrb[1].mxu0  ;;  %v863_v21 = vpack.c.bf16 %v314_v19, %v314_v19  ;;  %v903_v22 = vpop.f32.mrb[1].mxu1 }
  0xe9   : > { %v262_v23 = vpop.f32.mrb[2].mxu0  ;;  %v317_v25 = vpop.f32.mrb[2].mxu1 }
  0xea   : > { %716 = vst.msk [vmem:[%s1050_s21] sm:$0xf] %vm715_vm2, %v861_v18  ;;  %v862_v24 = vpack.c.bf16 %v262_v23, %v262_v23  ;;  %v898_v26 = vpop.f32.mrb[3].mxu0  ;;  %718 = vst.msk [vmem:[%s1050_s21 + $0x8] sm:$0xf] %vm715_vm2, %v863_v21  ;;  %v864_v27 = vpack.c.bf16 %v317_v25, %v317_v25  ;;  %v904_v28 = vpop.f32.mrb[3].mxu1 }
  0xec   : > { %717 = vst.msk [vmem:[%s1050_s21 + $0x4] sm:$0xf] %vm715_vm2, %v862_v24  ;;  %719 = vst.msk [vmem:[%s1050_s21 + $0xc] sm:$0xf] %vm715_vm2, %v864_v27 }
  0xef   : > { %v369_v29 = vpop.f32.mrb[4].mxu0  ;;  %v424_v31 = vpop.f32.mrb[4].mxu1 }
  0xf0   : > { %v865_v30 = vpack.c.bf16 %v369_v29, %v369_v29  ;;  %v909_v32 = vpop.f32.mrb[5].mxu0  ;;  %v867_v33 = vpack.c.bf16 %v424_v31, %v424_v31  ;;  %v915_v34 = vpop.f32.mrb[5].mxu1 }
  0xf1   : > { %v372_v35 = vpop.f32.mrb[6].mxu0  ;;  %v427_v37 = vpop.f32.mrb[6].mxu1 }
  0xf2   : > { %720 = vst.msk [vmem:[%s1050_s21 + $0x10] sm:$0xf] %vm715_vm2, %v865_v30  ;;  %v866_v36 = vpack.c.bf16 %v372_v35, %v372_v35  ;;  %v910_v38 = vpop.f32.mrb[7].mxu0  ;;  %722 = vst.msk [vmem:[%s1050_s21 + $0x18] sm:$0xf] %vm715_vm2, %v867_v33  ;;  %v868_v39 = vpack.c.bf16 %v427_v37, %v427_v37  ;;  %v916_v40 = vpop.f32.mrb[7].mxu1 }
  0xf4   : > { %721 = vst.msk [vmem:[%s1050_s21 + $0x14] sm:$0xf] %vm715_vm2, %v866_v36  ;;  %723 = vst.msk [vmem:[%s1050_s21 + $0x1c] sm:$0xf] %vm715_vm2, %v868_v39 }
  0xf7   : > { %v479_v41 = vpop.f32.mrb[8].mxu0  ;;  %v534_v43 = vpop.f32.mrb[8].mxu1 }
  0xf8   : > { %v869_v42 = vpack.c.bf16 %v479_v41, %v479_v41  ;;  %v921_v44 = vpop.f32.mrb[9].mxu0  ;;  %v871_v45 = vpack.c.bf16 %v534_v43, %v534_v43  ;;  %v927_v46 = vpop.f32.mrb[9].mxu1 }
  0xf9   : > { %v482_v47 = vpop.f32.mrb[10].mxu0  ;;  %v537_v49 = vpop.f32.mrb[10].mxu1 }
  0xfa   : > { %724 = vst.msk [vmem:[%s1050_s21 + $0x20] sm:$0xf] %vm715_vm2, %v869_v42  ;;  %v870_v48 = vpack.c.bf16 %v482_v47, %v482_v47  ;;  %v922_v50 = vpop.f32.mrb[11].mxu0  ;;  %726 = vst.msk [vmem:[%s1050_s21 + $0x28] sm:$0xf] %vm715_vm2, %v871_v45  ;;  %v872_v51 = vpack.c.bf16 %v537_v49, %v537_v49  ;;  %v928_v52 = vpop.f32.mrb[11].mxu1 }
  0xfc   : > { %725 = vst.msk [vmem:[%s1050_s21 + $0x24] sm:$0xf] %vm715_vm2, %v870_v48  ;;  %727 = vst.msk [vmem:[%s1050_s21 + $0x2c] sm:$0xf] %vm715_vm2, %v872_v51 }
  0xff   : > { %v589_v53 = vpop.f32.mrb[12].mxu0  ;;  %v644_v55 = vpop.f32.mrb[12].mxu1 }
 0x100   : > { %v873_v54 = vpack.c.bf16 %v589_v53, %v589_v53  ;;  %v933_v56 = vpop.f32.mrb[13].mxu0  ;;  %v875_v57 = vpack.c.bf16 %v644_v55, %v644_v55  ;;  %v939_v58 = vpop.f32.mrb[13].mxu1 }
 0x101   : > { %v592_v59 = vpop.f32.mrb[14].mxu0  ;;  %v647_v61 = vpop.f32.mrb[14].mxu1 }
 0x102   : > { %728 = vst.msk [vmem:[%s1050_s21 + $0x30] sm:$0xf] %vm715_vm2, %v873_v54  ;;  %v874_v60 = vpack.c.bf16 %v592_v59, %v592_v59  ;;  %v934_v62 = vpop.f32.mrb[15].mxu0  ;;  %730 = vst.msk [vmem:[%s1050_s21 + $0x38] sm:$0xf] %vm715_vm2, %v875_v57  ;;  %v876_v63 = vpack.c.bf16 %v647_v61, %v647_v61  ;;  %v940_v0 = vpop.f32.mrb[15].mxu1 }
 0x104   : > { %729 = vst.msk [vmem:[%s1050_s21 + $0x34] sm:$0xf] %vm715_vm2, %v874_v60  ;;  %731 = vst.msk [vmem:[%s1050_s21 + $0x3c] sm:$0xf] %vm715_vm2, %v876_v63 }
 0x105 PF: > { %s12_s9 = sadd.s32 1, %s973_s9  }
 0x106   : > { %p9_p4 = scmp.ge.s32.totalorder %s12_s9, 6  }
 0x108   :  { %11 = sbr.rel (!%p9_p4) target bundleno = 1 (0x1), region = 61 }

</bundles_post_ra>
